<compile_context>
chip_gen: v5e
topology: v5e:2x2
jax: 0.10.0
libtpu: 0.0.40
codegen_flags: <defaults>
</compile_context>

<pallas_src>
import jax
import jax.numpy as jnp
from jax.experimental import pallas as pl
from jax.experimental.pallas import tpu as pltpu


def _cross_sum_kernel(x_ref, o_ref):
    # x_ref: (TB, D) block in VMEM ; o_ref: (1, TB) block in VMEM (lane-dense).
    x = x_ref[...].astype(jnp.float32)            # cast to f32 in-kernel
    s = jnp.sum(x, axis=-1)                       # (TB,)  row sums
    sq = jnp.sum(x * x, axis=-1)                  # (TB,)  row sums of squares
    out = 0.5 * (s * s - sq)                      # strictly-lower-tri sum per row
    o_ref[...] = out[None, :]                     # (1, TB) full-lane store


def _round_up(x, m):
    return ((x + m - 1) // m) * m


def cross_product_net(emb_x, *, block_rows=512):
    """emb_x: (B, D) array. Returns (B, 1) float32."""
    B, D = emb_x.shape

    # Tile size: multiple of 128 (lane-dense output, sublane-aligned input),
    # capped so the double-buffered input tile stays well under the smallest
    # scoped-VMEM default (v5e: 16 MiB).
    bytes_per_row = D * emb_x.dtype.itemsize
    max_rows = max(128, ((8 * 1024 * 1024) // max(1, 2 * bytes_per_row)) // 128 * 128)
    tb = min(block_rows, _round_up(B, 128), max_rows)

    b_pad = pl.cdiv(B, tb) * tb
    if b_pad != B:
        emb_x_p = jnp.pad(emb_x, ((0, b_pad - B), (0, 0)))
    else:
        emb_x_p = emb_x
    num_tiles = b_pad // tb

    out_row = pl.pallas_call(
        _cross_sum_kernel,
        out_shape=jax.ShapeDtypeStruct((1, b_pad), jnp.float32),
        grid=(num_tiles,),
        in_specs=[pl.BlockSpec((tb, D), lambda i: (i, 0))],
        out_specs=pl.BlockSpec((1, tb), lambda i: (0, i)),
        compiler_params=pltpu.CompilerParams(
            dimension_semantics=("parallel",)),
    )(emb_x_p)

    # Layout plumbing only: drop padding rows, present as (B, 1).
    return out_row[0, :B][:, None]


if __name__ == "__main__":
    key = jax.random.PRNGKey(0)
    B, D = 2, 32
    emb_x = jax.random.normal(key, (B, D), dtype=jnp.float32)

    out = cross_product_net(emb_x)
    out = jax.block_until_ready(out)

    # Explicit reference: strictly-lower-triangular masked outer-product sum.
    cross = emb_x[:, :, None] * emb_x[:, None, :]            # (B, D, D)
    mask = jnp.tril(jnp.ones((D, D), dtype=bool), k=-1)      # (D, D)
    ref = jnp.sum(jnp.where(mask[None], cross, 0.0), axis=(1, 2))[:, None]

    assert out.shape == (B, 1)
    assert out.dtype == jnp.float32
    assert jnp.allclose(out, ref, rtol=1e-5, atol=1e-5)

    print("KERNEL_OK")
</pallas_src>

<mosaic_0001>
module attributes {stable_mosaic.version = 11 : i64} {
  func.func @_cross_sum_kernel(%arg0: i32, %arg1: memref<128x32xf32, #tpu.memory_space<vmem>>, %arg2: memref<1x128xf32, #tpu.memory_space<vmem>>) attributes {dimension_semantics = [#tpu.dimension_semantics<parallel>], iteration_bounds = array<i64: 1>, scalar_prefetch = 0 : i64, scratch_operands = 0 : i64, tpu.core_type = #tpu.core_type<tc>, window_params = [{transform_indices = @transform_0, window_bounds = array<i64: 128, 32>}, {transform_indices = @transform_1, window_bounds = array<i64: 1, 128>}]} {
    %c0 = arith.constant 0 : index
    %c0_0 = arith.constant 0 : index
    %0 = vector.load %arg1[%c0, %c0_0] : memref<128x32xf32, #tpu.memory_space<vmem>>, vector<128x32xf32>
    %cst = arith.constant dense<0.000000e+00> : vector<128xf32>
    %1 = vector.multi_reduction <add>, %0, %cst [1] : vector<128x32xf32> to vector<128xf32>
    %2 = arith.mulf %0, %0 : vector<128x32xf32>
    %cst_1 = arith.constant dense<0.000000e+00> : vector<128xf32>
    %3 = vector.multi_reduction <add>, %2, %cst_1 [1] : vector<128x32xf32> to vector<128xf32>
    %4 = arith.mulf %1, %1 : vector<128xf32>
    %5 = arith.subf %4, %3 : vector<128xf32>
    %cst_2 = arith.constant 5.000000e-01 : f32
    %6 = vector.broadcast %cst_2 : f32 to vector<128xf32>
    %7 = arith.mulf %6, %5 : vector<128xf32>
    %8 = vector.shape_cast %7 : vector<128xf32> to vector<1x128xf32>
    %c0_3 = arith.constant 0 : index
    %c0_4 = arith.constant 0 : index
    %9 = vector.load %arg2[%c0_3, %c0_4] : memref<1x128xf32, #tpu.memory_space<vmem>>, vector<1x128xf32>
    tpu.vector_store %arg2[%c0_3, %c0_4], %8 {strides = array<i32>} : memref<1x128xf32, #tpu.memory_space<vmem>>, vector<1x128xf32>,
    return
  }
  func.func @transform_0(%arg0: i32) -> (i32, i32) {
    %c0_i32 = arith.constant 0 : i32
    %c0_i32_0 = arith.constant 0 : i32
    return %arg0, %c0_i32 : i32, i32
  }
  func.func @transform_1(%arg0: i32) -> (i32, i32) {
    %c0_i32 = arith.constant 0 : i32
    %c0_i32_0 = arith.constant 0 : i32
    return %c0_i32, %arg0 : i32, i32
  }
}

</mosaic_0001>

<bundles_post_ra>
// kernel: tpu_custom_call.1
= control target key start
LH: loop header
LB: loop body
LE: loop exit
PB: predicated region body
PF: predicated region fallthrough
CT: control target
= control target key end

     0   :  { %vm25_vm0 = vcmask 261120   ;;  %s434_s0 = inlined_call_operand.vmem [shape: f32[128,32], index: 0, kind: input, shape index: {}]   ;;  %s435_s1 = inlined_call_operand.hbm [shape: f32[1,128], index: 1, kind: output, shape index: {}]  }
   0x1   :  { %v13_v0 = vld [vmem:[%s434_s0 + $0x20] sm:$0xff]  ;;  %v11_v1 = vld [vmem:[%s434_s0 + $0x10] sm:$0xff]  ;;  %v14_v6 = vld [vmem:[%s434_s0 + $0x28] sm:$0xff] }
   0x2   :  { %v9_v2 = vld [vmem:[%s434_s0] sm:$0xff]  ;;  %v38_v3 = vsel %vm25_vm0, %v13_v0, 0.0  ;;  %v32_v4 = vsel %vm25_vm0, %v11_v1, 0.0  ;;  %v12_v7 = vld [vmem:[%s434_s0 + $0x18] sm:$0xff] }
   0x3   :  { %39 = vadd.xlane.f32.xlu2 %v38_v3  ;;  %33 = vadd.xlane.f32.xlu1 %v32_v4  ;;  %v26_v5 = vsel %vm25_vm0, %v9_v2, 0.0 }
   0x4   :  { %27 = vadd.xlane.f32.xlu0 %v26_v5 }
   0x5   :  { %6 = vsyncpa [#allocation3], 0  ;;  %v10_v8 = vld [vmem:[%s434_s0 + $0x8] sm:$0xff]  ;;  %v41_v9 = vsel %vm25_vm0, %v14_v6, 0.0  ;;  %v35_v10 = vsel %vm25_vm0, %v12_v7, 0.0  ;;  %v17_v12 = vld [vmem:[%s434_s0 + $0x40] sm:$0xff]  ;;  %v76_v24 = vmul.f32 %v11_v1, %v11_v1  ;;  %v74_v26 = vmul.f32 %v9_v2, %v9_v2 }
   0x6   :  { %v29_v11 = vsel %vm25_vm0, %v10_v8, 0.0  ;;  %v16_v13 = vld [vmem:[%s434_s0 + $0x38] sm:$0xff]  ;;  %v15_v14 = vld [vmem:[%s434_s0 + $0x30] sm:$0xff]  ;;  %v50_v15 = vsel %vm25_vm0, %v17_v12, 0.0  ;;  %v18_v20 = vld [vmem:[%s434_s0 + $0x48] sm:$0xff]  ;;  %v75_v25 = vmul.f32 %v10_v8, %v10_v8  ;;  %v78_v30 = vmul.f32 %v13_v0, %v13_v0  ;;  %s274_s12 = sshll.u32 %s435_s1, 4  ;;  %s275_s12 = int_to_ptr.hbm [resolvable:$true] %s274_s12 }
   0x7   :  { %v47_v16 = vsel %vm25_vm0, %v16_v13, 0.0  ;;  %v44_v17 = vsel %vm25_vm0, %v15_v14, 0.0  ;;  %v20_v18 = vld [vmem:[%s434_s0 + $0x58] sm:$0xff]  ;;  %v19_v19 = vld [vmem:[%s434_s0 + $0x50] sm:$0xff]  ;;  %v53_v23 = vsel %vm25_vm0, %v18_v20, 0.0  ;;  %v96_v27 = vsel %vm25_vm0, %v76_v24, 0.0 }
   0x8   :  { %v59_v21 = vsel %vm25_vm0, %v20_v18, 0.0  ;;  %v56_v22 = vsel %vm25_vm0, %v19_v19, 0.0  ;;  %v93_v28 = vsel %vm25_vm0, %v75_v25, 0.0  ;;  %v90_v29 = vsel %vm25_vm0, %v74_v26, 0.0  ;;  %v21_v43 = vld [vmem:[%s434_s0 + $0x60] sm:$0xff]  ;;  %v23_v49 = vld [vmem:[%s434_s0 + $0x70] sm:$0xff] }
   0x9   :  { %v79_v31 = vmul.f32 %v14_v6, %v14_v6  ;;  %v77_v32 = vmul.f32 %v12_v7, %v12_v7  ;;  %v102_v34 = vsel %vm25_vm0, %v78_v30, 0.0  ;;  %v82_v36 = vmul.f32 %v17_v12, %v17_v12  ;;  %v22_v50 = vld [vmem:[%s434_s0 + $0x68] sm:$0xff]  ;;  %v24_v55 = vld [vmem:[%s434_s0 + $0x78] sm:$0xff]  ;;  %s310_s0 = smov [#allocation2]  }
   0xa   :  { %v81_v37 = vmul.f32 %v16_v13, %v16_v13  ;;  %v80_v38 = vmul.f32 %v15_v14, %v15_v14  ;;  %v84_v42 = vmul.f32 %v19_v19, %v19_v19  ;;  %v83_v44 = vmul.f32 %v18_v20, %v18_v20  ;;  %s272_s9 = sshll.u32 %s310_s0, 4  ;;  %s273_s9 = int_to_ptr.vmem [resolvable:$true] %s272_s9 }
   0xb   :  { %42 = vadd.xlane.f32.xlu2 %v41_v9  ;;  %36 = vadd.xlane.f32.xlu1 %v35_v10  ;;  %v105_v33 = vsel %vm25_vm0, %v79_v31, 0.0  ;;  %v99_v35 = vsel %vm25_vm0, %v77_v32, 0.0  ;;  %v114_v39 = vsel %vm25_vm0, %v82_v36, 0.0  ;;  %v62_v46 = vsel %vm25_vm0, %v21_v43, 0.0 }
   0xc   :  { %30 = vadd.xlane.f32.xlu0 %v29_v11  ;;  %v111_v40 = vsel %vm25_vm0, %v81_v37, 0.0  ;;  %v108_v41 = vsel %vm25_vm0, %v80_v38, 0.0  ;;  %v120_v45 = vsel %vm25_vm0, %v84_v42, 0.0  ;;  %v117_v47 = vsel %vm25_vm0, %v83_v44, 0.0 }
   0xd   :  { %v85_v48 = vmul.f32 %v20_v18, %v20_v18  ;;  %v68_v51 = vsel %vm25_vm0, %v23_v49, 0.0  ;;  %v65_v53 = vsel %vm25_vm0, %v22_v50, 0.0  ;;  %v87_v54 = vmul.f32 %v22_v50, %v22_v50 }
   0xe   :  { %v86_v56 = vmul.f32 %v21_v43, %v21_v43  ;;  %v71_v58 = vsel %vm25_vm0, %v24_v55, 0.0  ;;  %v89_v60 = vmul.f32 %v24_v55, %v24_v55  ;;  %v88_v61 = vmul.f32 %v23_v49, %v23_v49 }
   0xf   :  { %v123_v52 = vsel %vm25_vm0, %v85_v48, 0.0  ;;  %v129_v57 = vsel %vm25_vm0, %v87_v54, 0.0  ;;  %v202_v12 = vlaneseq  ;;  %vm207_vm1 = vcmask 130112  }
  0x10   :  { %v126_v59 = vsel %vm25_vm0, %v86_v56, 0.0  ;;  %v135_v62 = vsel %vm25_vm0, %v89_v60, 0.0  ;;  %v132_v63 = vsel %vm25_vm0, %v88_v61, 0.0  ;;  %vm211_vm2 = vcmask 195712  }
  0x11   :  { %v407_v13 = vand.u32 127, %v202_v12  ;;  %vm215_vm3 = vcmask 261312   ;;  %vm219_vm4 = vcmask 326912   ;;  %vm223_vm5 = vcmask 392512  }
  0x12   :  { %vm227_vm6 = vcmask 458112   ;;  %vm231_vm7 = vcmask 523712   ;;  %vm235_vm8 = vcmask 589312   ;;  %vm239_vm9 = vcmask 654912  }
  0x13   :  { %51 = vadd.xlane.f32.xlu2 %v50_v15  ;;  %48 = vadd.xlane.f32.xlu1 %v47_v16  ;;  %v209_v19 = vadd.s32 4294967280, %v407_v13  ;;  %v217_v50 = vadd.s32 4294967264, %v407_v13  ;;  %vm243_vm10 = vcmask 720512   ;;  %vm247_vm11 = vcmask 786112  }
  0x14   :  { %45 = vadd.xlane.f32.xlu0 %v44_v17  ;;  %vm251_vm12 = vcmask 851712   ;;  %vm255_vm13 = vcmask 917312   ;;  %vm259_vm14 = vcmask 982912   ;;  %vm263_vm15 = vcmask 1048512  }
  0x1b   :  { %60 = vadd.xlane.f32.xlu2 %v59_v21  ;;  %57 = vadd.xlane.f32.xlu1 %v56_v22  ;;  %v205_v21 = vadd.s32 4294967288, %v407_v13 }
  0x1c   :  { %54 = vadd.xlane.f32.xlu0 %v53_v23 }
  0x23   :  { %97 = vadd.xlane.f32.xlu2 %v96_v27  ;;  %94 = vadd.xlane.f32.xlu1 %v93_v28 }
  0x24   :  { %91 = vadd.xlane.f32.xlu0 %v90_v29 }
  0x2b   :  { %106 = vadd.xlane.f32.xlu2 %v105_v33  ;;  %103 = vadd.xlane.f32.xlu1 %v102_v34 }
  0x2c   :  { %100 = vadd.xlane.f32.xlu0 %v99_v35 }
  0x33   :  { %115 = vadd.xlane.f32.xlu2 %v114_v39  ;;  %112 = vadd.xlane.f32.xlu1 %v111_v40 }
  0x34   :  { %109 = vadd.xlane.f32.xlu0 %v108_v41 }
  0x3b   :  { %121 = vadd.xlane.f32.xlu2 %v120_v45  ;;  %63 = vadd.xlane.f32.xlu1 %v62_v46  ;;  %v213_v45 = vadd.s32 4294967272, %v407_v13 }
  0x3c   :  { %118 = vadd.xlane.f32.xlu0 %v117_v47 }
  0x43   :  { %69 = vadd.xlane.f32.xlu2 %v68_v51  ;;  %124 = vadd.xlane.f32.xlu1 %v123_v52 }
  0x44   :  { %66 = vadd.xlane.f32.xlu0 %v65_v53 }
  0x4b   :  { %130 = vadd.xlane.f32.xlu2 %v129_v57  ;;  %72 = vadd.xlane.f32.xlu1 %v71_v58  ;;  %v221_v57 = vadd.s32 4294967256, %v407_v13 }
  0x4c   :  { %127 = vadd.xlane.f32.xlu0 %v126_v59  ;;  %v225_v59 = vadd.s32 4294967248, %v407_v13 }
  0x53   :  { %136 = vadd.xlane.f32.xlu1 %v135_v62 }
  0x54   :  { %133 = vadd.xlane.f32.xlu0 %v132_v63 }
  0x76   :  { %v40_v0 = vpop.xlane.xlu2 %39  ;;  %v34_v1 = vpop.xlane.xlu1 %33 }
  0x77   :  { %v28_v2 = vpop.xlane.xlu0 %27  ;;  %v140_v14 = vmul.f32 %v34_v1, %v34_v1  ;;  %v142_v41 = vmul.f32 %v40_v0, %v40_v0 }
  0x78   :  { %v138_v16 = vmul.f32 %v28_v2, %v28_v2 }
  0x7e   :  { %v43_v3 = vpop.xlane.xlu2 %42  ;;  %v37_v4 = vpop.xlane.xlu1 %36 }
  0x7f   :  { %v31_v5 = vpop.xlane.xlu0 %30  ;;  %v141_v39 = vmul.f32 %v37_v4, %v37_v4  ;;  %v143_v49 = vmul.f32 %v43_v3, %v43_v3  ;;  %v229_v4 = vadd.s32 4294967240, %v407_v13 }
  0x80   :  { %v139_v15 = vmul.f32 %v31_v5, %v31_v5 }
  0x86   :  { %v401_v6 = vpop.xlane.xlu2 %51  ;;  %v49_v7 = vpop.xlane.xlu1 %48 }
  0x87   :  { %v46_v8 = vpop.xlane.xlu0 %45  ;;  %v145_v53 = vmul.f32 %v49_v7, %v49_v7  ;;  %v146_v3 = vmul.f32 %v401_v6, %v401_v6  ;;  %v237_v6 = vadd.s32 4294967224, %v407_v13 }
  0x88   :  { %v144_v48 = vmul.f32 %v46_v8, %v46_v8 }
  0x8e   :  { %v403_v9 = vpop.xlane.xlu2 %60  ;;  %v405_v10 = vpop.xlane.xlu1 %57 }
  0x8f   :  { %v55_v11 = vpop.xlane.xlu0 %54  ;;  %v148_v8 = vmul.f32 %v405_v10, %v405_v10 }
  0x90   :  { %v147_v63 = vmul.f32 %v55_v11, %v55_v11  ;;  %v149_v11 = vmul.f32 %v403_v9, %v403_v9 }
  0x96   :  { %v98_v17 = vpop.xlane.xlu2 %97  ;;  %v95_v18 = vpop.xlane.xlu1 %94 }
  0x97   :  { %v156_v20 = vsub.f32 %v140_v14, %v98_v17  ;;  %v155_v22 = vsub.f32 %v139_v15, %v95_v18  ;;  %v92_v23 = vpop.xlane.xlu0 %91  ;;  %v233_v17 = vadd.s32 4294967232, %v407_v13 }
  0x98   :  { %v154_v24 = vsub.f32 %v138_v16, %v92_v23 }
  0x99   :  { %v172_v25 = vmul.f32 0.5, %v156_v20  ;;  %v171_v26 = vmul.f32 0.5, %v155_v22 }
  0x9a   :  { %v170_v27 = vmul.f32 0.5, %v154_v24 }
  0x9b   :  { %v210_v28 = vperm.slane %v172_v25, %v209_v19  ;;  %v206_v29 = vperm.slane %v171_v26, %v205_v21 }
  0x9c   :  { %v204_v30 = vperm.slane %v170_v27, %v407_v13  ;;  %v241_v27 = vadd.s32 4294967216, %v407_v13 }
  0x9e   :  { %v208_v31 = vsel %vm207_vm1, %v206_v29, %v204_v30  ;;  %v107_v32 = vpop.xlane.xlu2 %106  ;;  %v104_v33 = vpop.xlane.xlu1 %103  ;;  %v245_v30 = vadd.s32 4294967208, %v407_v13 }
  0x9f   :  { %v212_v34 = vsel %vm211_vm2, %v210_v28, %v208_v31  ;;  %v101_v35 = vpop.xlane.xlu0 %100  ;;  %v158_v42 = vsub.f32 %v142_v41, %v104_v33  ;;  %v159_v54 = vsub.f32 %v143_v49, %v107_v32  ;;  %v253_v41 = vadd.s32 4294967192, %v407_v13 }
  0xa0   :  { %v157_v40 = vsub.f32 %v141_v39, %v101_v35  ;;  %v261_v49 = vadd.s32 4294967176, %v407_v13 }
  0xa1   :  { %v174_v51 = vmul.f32 0.5, %v158_v42  ;;  %v175_v0 = vmul.f32 0.5, %v159_v54 }
  0xa2   :  { %v173_v46 = vmul.f32 0.5, %v157_v40 }
  0xa3   :  { %v218_v58 = vperm.slane %v174_v51, %v217_v50  ;;  %v222_v16 = vperm.slane %v175_v0, %v221_v57 }
  0xa4   :  { %v214_v55 = vperm.slane %v173_v46, %v213_v45 }
  0xa6   :  { %v116_v36 = vpop.xlane.xlu2 %115  ;;  %v113_v37 = vpop.xlane.xlu1 %112  ;;  %v216_v1 = vsel %vm215_vm3, %v214_v55, %v212_v34 }
  0xa7   :  { %v110_v38 = vpop.xlane.xlu0 %109  ;;  %v161_v56 = vsub.f32 %v145_v53, %v113_v37  ;;  %v220_v12 = vsel %vm219_vm4, %v218_v58, %v216_v1  ;;  %v162_v14 = vsub.f32 %v146_v3, %v116_v36  ;;  %v249_v37 = vadd.s32 4294967200, %v407_v13 }
  0xa8   :  { %v160_v52 = vsub.f32 %v144_v48, %v110_v38  ;;  %v224_v20 = vsel %vm223_vm5, %v222_v16, %v220_v12  ;;  %v257_v53 = vadd.s32 4294967184, %v407_v13 }
  0xa9   :  { %v177_v5 = vmul.f32 0.5, %v161_v56  ;;  %v178_v23 = vmul.f32 0.5, %v162_v14 }
  0xaa   :  { %v176_v60 = vmul.f32 0.5, %v160_v52 }
  0xab   :  { %v230_v19 = vperm.slane %v177_v5, %v229_v4  ;;  %v234_v36 = vperm.slane %v178_v23, %v233_v17 }
  0xac   :  { %v226_v15 = vperm.slane %v176_v60, %v225_v59 }
  0xae   :  { %v122_v43 = vpop.xlane.xlu2 %121  ;;  %v64_v44 = vpop.xlane.xlu1 %63  ;;  %v228_v10 = vsel %vm227_vm6, %v226_v15, %v224_v20 }
  0xaf   :  { %v119_v47 = vpop.xlane.xlu0 %118  ;;  %v164_v18 = vsub.f32 %v148_v8, %v122_v43  ;;  %v150_v24 = vmul.f32 %v64_v44, %v64_v44  ;;  %v232_v32 = vsel %vm231_vm7, %v230_v19, %v228_v10 }
  0xb0   :  { %v163_v7 = vsub.f32 %v147_v63, %v119_v47  ;;  %v236_v40 = vsel %vm235_vm8, %v234_v36, %v232_v32 }
  0xb1   :  { %v180_v29 = vmul.f32 0.5, %v164_v18 }
  0xb2   :  { %v179_v21 = vmul.f32 0.5, %v163_v7 }
  0xb3   :  { %v242_v39 = vperm.slane %v180_v29, %v241_v27 }
  0xb4   :  { %v238_v33 = vperm.slane %v179_v21, %v237_v6 }
  0xb6   :  { %v70_v61 = vpop.xlane.xlu2 %69  ;;  %v125_v62 = vpop.xlane.xlu1 %124  ;;  %v240_v42 = vsel %vm239_vm9, %v238_v33, %v236_v40 }
  0xb7   :  { %v67_v2 = vpop.xlane.xlu0 %66  ;;  %v165_v22 = vsub.f32 %v149_v11, %v125_v62  ;;  %v152_v46 = vmul.f32 %v70_v61, %v70_v61  ;;  %v244_v52 = vsel %vm243_vm10, %v242_v39, %v240_v42 }
  0xb8   :  { %v151_v9 = vmul.f32 %v67_v2, %v67_v2 }
  0xb9   :  { %v181_v34 = vmul.f32 0.5, %v165_v22 }
  0xbb   :  { %v246_v43 = vperm.slane %v181_v34, %v245_v30 }
  0xbd   :  { %v248_v55 = vsel %vm247_vm11, %v246_v43, %v244_v52 }
  0xbe   :  { %v131_v25 = vpop.xlane.xlu2 %130  ;;  %v73_v26 = vpop.xlane.xlu1 %72 }
  0xbf   :  { %v128_v28 = vpop.xlane.xlu0 %127  ;;  %v167_v35 = vsub.f32 %v151_v9, %v131_v25  ;;  %v153_v45 = vmul.f32 %v73_v26, %v73_v26 }
  0xc0   :  { %v166_v31 = vsub.f32 %v150_v24, %v128_v28 }
  0xc1   :  { %v183_v44 = vmul.f32 0.5, %v167_v35 }
  0xc2   :  { %v182_v38 = vmul.f32 0.5, %v166_v31 }
  0xc3   :  { %v254_v56 = vperm.slane %v183_v44, %v253_v41 }
  0xc4   :  { %v250_v47 = vperm.slane %v182_v38, %v249_v37 }
  0xc6   :  { %v137_v48 = vpop.xlane.xlu1 %136  ;;  %v252_v58 = vsel %vm251_vm12, %v250_v47, %v248_v55 }
  0xc7   :  { %v169_v50 = vsub.f32 %v153_v45, %v137_v48  ;;  %v134_v51 = vpop.xlane.xlu0 %133  ;;  %v256_v62 = vsel %vm255_vm13, %v254_v56, %v252_v58 }
  0xc8   :  { %v168_v54 = vsub.f32 %v152_v46, %v134_v51 }
  0xc9   :  { %v185_v57 = vmul.f32 0.5, %v169_v50 }
  0xca   :  { %v184_v59 = vmul.f32 0.5, %v168_v54 }
  0xcb   :  { %v262_v60 = vperm.slane %v185_v57, %v261_v49 }
  0xcc   :  { %v258_v61 = vperm.slane %v184_v59, %v257_v53 }
  0xce   :  { %v260_v63 = vsel %vm259_vm14, %v258_v61, %v256_v62 }
  0xcf   :  { %v264_v13 = vsel %vm263_vm15, %v262_v60, %v260_v63 }
  0xd0   :  { %266 = vst [vmem:[#allocation2] sm:$0x1] %v264_v13 }
  0xd1   :  { %277 = dma.vmem_to_hbm [thread:$0]  %s273_s9, 16, %s275_s12, [#allocation3]  }
  0xd2   :  { %308 = dma.done.wait [#allocation3], 16  }
  0xd3   :  { %309 = vsyncadd [#allocation3], 4294967280 }
  0xd4   :  { %282 = vsyncpa [#allocation3], 1 }

</bundles_post_ra>
